<compile_context>
chip_gen: v6e
topology: v6e:2x2x1
jax: 0.10.0
libtpu: 0.0.40
codegen_flags: <defaults>
</compile_context>

<pallas_src>
import functools

import jax
import jax.numpy as jnp
from jax.experimental import pallas as pl
from jax.experimental.pallas import tpu as pltpu

_CHUNK = 16             # timesteps per chunk-local sublane scan (2 f32 sublane tiles)
_MAX_LANE_BLOCK = 2048  # cap on lane width per block


def _round_up(n, m):
    return (n + m - 1) // m * m


def _soft_prefix_max_kernel(x_ref, o_ref, carry_ref, *, mask_threshold, scale, chunk):
    """Block = (1, t_blk, d_blk); carry_ref = (1, d_blk) running logsumexp."""
    t_idx = pl.program_id(2)

    @pl.when(t_idx == 0)
    def _init():
        carry_ref[...] = jnp.full(carry_ref.shape, -jnp.inf, jnp.float32)

    t_blk = x_ref.shape[1]
    d_blk = x_ref.shape[2]
    scale_f = jnp.float32(scale)
    inv_scale = jnp.float32(1.0 / scale)
    neg_inf = jnp.float32(-jnp.inf)

    if mask_threshold is None:
        feat_mask = None  # dimensions >= D: statically skip the select
    else:
        d_off = pl.program_id(1) * d_blk
        lane = jax.lax.broadcasted_iota(jnp.int32, (1, d_blk), 1) + d_off
        feat_mask = lane < mask_threshold

    def scan_chunk(start, size, row_iota):
        xc = x_ref[0, pl.ds(start, size), :]           # (size, d_blk), input dtype
        xf = xc.astype(jnp.float32)
        s = xf * scale_f

        def shifted_down(v, shift):
            # v shifted toward higher timestep indices; vacated rows = -inf.
            if size % 8 == 0:
                r = pltpu.roll(v, shift=shift, axis=0)  # r[i] = v[i - shift] (wrap)
                return jnp.where(row_iota >= shift, r, neg_inf)
            # Rare ragged-size fallback (non multiple-of-8 sublane count).
            pad = jnp.full((shift, d_blk), neg_inf, jnp.float32)
            return jnp.concatenate([pad, v[: size - shift, :]], axis=0)

        # Chunk-local inclusive logaddexp prefix scan (Hillis-Steele, log2(size) steps).
        shift = 1
        while shift < size:
            s = jnp.logaddexp(s, shifted_down(s, shift))
            shift *= 2

        # Fold the running carry in with one vectorized combine; new carry = last row.
        # (jnp.logaddexp handles -inf / -inf correctly, so -inf inputs stay -inf.)
        s = jnp.logaddexp(s, carry_ref[...])
        carry_ref[...] = s[size - 1:size, :]

        out = s * inv_scale
        if feat_mask is not None:
            out = jnp.where(feat_mask, out, xf)
        o_ref[0, pl.ds(start, size), :] = out.astype(o_ref.dtype)

    n_full = t_blk // chunk
    rem = t_blk - n_full * chunk

    if n_full > 0:
        row_full = jax.lax.broadcasted_iota(jnp.int32, (chunk, d_blk), 0)
        n_pairs = n_full // 2
        if n_pairs > 0:
            # Two chunks per loop iteration: chunk c+1's local scan is independent
            # of chunk c (only the tiny carry combine is serial), so the scheduler
            # can overlap their EUP chains.
            @pl.loop(0, n_pairs)
            def _pair(p):
                base = pl.multiple_of(p * (2 * chunk), 2 * chunk)
                scan_chunk(base, chunk, row_full)
                scan_chunk(base + chunk, chunk, row_full)
        if n_full % 2:
            scan_chunk((n_full - 1) * chunk, chunk, row_full)
    if rem > 0:
        row_rem = jax.lax.broadcasted_iota(jnp.int32, (rem, d_blk), 0)
        scan_chunk(n_full * chunk, rem, row_rem)

    # TODO(synk): an (m, l)-pair Hillis-Steele combine (1 exp/step + one deferred
    # log per chunk) would further cut EUP work if this ever becomes EUP-bound.


def _vmem_capacity_bytes():
    try:
        return int(pltpu.get_tpu_info().vmem_capacity_bytes)
    except Exception:
        return 64 << 20  # conservative default (v7x per-TensorCore VMEM)


def _choose_d_block(n_batch, n_lane):
    """Lane-block width: full width unless it is a 128-multiple we can split."""
    if n_lane % 128 != 0:
        return n_lane
    d_blk = n_lane
    while d_blk > _MAX_LANE_BLOCK and d_blk % 256 == 0:
        d_blk //= 2
    # Expose >= 2 parallel (batch, lane) tiles for v7x's two TensorCores.
    if n_batch * (n_lane // d_blk) < 2 and d_blk % 256 == 0:
        d_blk //= 2
    return d_blk


def _choose_t_block(T, d_blk, itemsize, t_tile):
    budget = _vmem_capacity_bytes() // 4            # generation-aware block budget
    bytes_per_row = max(1, 4 * d_blk * itemsize)    # double-buffered in + out rows
    max_rows = max(_CHUNK, budget // bytes_per_row)
    t_tile = max(_CHUNK, (int(t_tile) // _CHUNK) * _CHUNK)
    t_blk = max(_CHUNK, min(t_tile, (max_rows // _CHUNK) * _CHUNK))
    if T <= t_blk:
        return T                                    # single block == full extent
    return t_blk                                    # multiple of _CHUNK (hence of 8)


def _scan_pallas(x, *, mask_threshold, scale, t_tile):
    """Prefix logsumexp over axis 1 of a (Bk, T, Dk) array (lanes >= mask pass through)."""
    Bk, T, Dk = x.shape
    d_blk = _choose_d_block(Bk, Dk)
    t_blk = _choose_t_block(T, d_blk, x.dtype.itemsize, t_tile)
    chunk = min(_CHUNK, t_blk)
    grid = (Bk, Dk // d_blk, pl.cdiv(T, t_blk))

    block_bytes = t_blk * d_blk * x.dtype.itemsize
    vmem_need = 4 * block_bytes + 4 * d_blk + (4 << 20)   # dbl-buffered io + carry + slack
    vmem_limit = int(min(max(vmem_need, 8 << 20), _vmem_capacity_bytes() - (8 << 20)))
    vmem_limit = max(vmem_limit, vmem_need)

    kernel = functools.partial(
        _soft_prefix_max_kernel,
        mask_threshold=mask_threshold,
        scale=float(scale),
        chunk=chunk,
    )
    return pl.pallas_call(
        kernel,
        out_shape=jax.ShapeDtypeStruct((Bk, T, Dk), x.dtype),
        grid_spec=pltpu.PrefetchScalarGridSpec(
            num_scalar_prefetch=0,
            grid=grid,
            in_specs=[pl.BlockSpec((1, t_blk, d_blk), lambda b, d, t: (b, t, d))],
            out_specs=pl.BlockSpec((1, t_blk, d_blk), lambda b, d, t: (b, t, d)),
            scratch_shapes=[pltpu.VMEM((1, d_blk), jnp.float32)],  # running logsumexp carry
        ),
        compiler_params=pltpu.CompilerParams(
            dimension_semantics=("parallel", "parallel", "arbitrary"),
            vmem_limit_bytes=vmem_limit,
        ),
    )(x)


def soft_prefix_max(x, dimensions, scale=5.0, t_tile=1024):
    """Functional equivalent of SoftPrefixMax.forward for x of shape (B, T, D)."""
    B, T, D = x.shape
    dims = int(min(max(int(dimensions), 0), D))
    if dims == 0 or T == 0:
        return x

    if D >= 128:
        # Scan over the full feature width; lanes >= dims pass through via an
        # in-kernel select (statically skipped when dims == D).
        mask_threshold = None if dims >= D else dims
        return _scan_pallas(x, mask_threshold=mask_threshold, scale=scale, t_tile=t_tile)

    # D < 128: lane-dense packing.  Fold (batch, scanned-features) into the lane
    # axis, pad to a multiple of 128, scan once, then unpack.  The scan is
    # independent per lane, so this is exact, and it replaces 25%-occupancy
    # masked stores with full-lane vst.
    part = x[..., :dims]                                      # (B, T, dims)
    packed = jnp.transpose(part, (1, 0, 2)).reshape(T, B * dims)
    lanes = _round_up(max(B * dims, 128), 128)
    if lanes > B * dims:
        packed = jnp.pad(packed, ((0, 0), (0, lanes - B * dims)))
    y = _scan_pallas(packed[None], mask_threshold=None, scale=scale, t_tile=t_tile)
    y = y[0, :, :B * dims].reshape(T, B, dims).transpose(1, 0, 2)
    if dims == D:
        return y
    return jnp.concatenate([y, x[..., dims:]], axis=-1)


def soft_prefix_max_ref(x, dimensions, scale=5.0):
    # Pure-JAX reference of the PyTorch semantics.
    dims = min(int(dimensions), x.shape[-1])
    part = x[..., :dims].astype(jnp.float32) * scale
    lcse = jax.lax.associative_scan(jnp.logaddexp, part, axis=1) / scale
    return jnp.concatenate([lcse.astype(x.dtype), x[..., dims:]], axis=-1)


if __name__ == "__main__":
    key = jax.random.PRNGKey(0)

    # SoftPrefixMax has no learned parameters; `dimensions` is the only hyperparam.
    configs = [
        # (B, T, D, dimensions, t_tile)
        (2, 8, 32, 16, 1024),    # D < 128 -> lane-dense packed path
        (2, 40, 128, 96, 1024),  # in-kernel feature mask, chunk pair + ragged tail chunk
        (1, 72, 256, 192, 32),   # lane-split grid, carry across T blocks, ragged last block
    ]
    for i, (B, T, D, dims, t_tile) in enumerate(configs):
        key, sub = jax.random.split(key)
        x = jax.random.normal(sub, (B, T, D), dtype=jnp.float32)
        out = jax.block_until_ready(soft_prefix_max(x, dims, t_tile=t_tile))
        ref = soft_prefix_max_ref(x, dims)
        assert out.shape == x.shape and out.dtype == x.dtype, f"config {i} shape/dtype"
        assert jnp.allclose(out, ref, atol=3e-5, rtol=3e-5), f"config {i} mismatch"

    print("KERNEL_OK")
</pallas_src>

<mosaic_0001>
module attributes {stable_mosaic.version = 11 : i64} {
  func.func @_soft_prefix_max_kernel(%arg0: i32, %arg1: i32, %arg2: i32, %arg3: memref<1x8x128xf32, #tpu.memory_space<vmem>>, %arg4: memref<1x8x128xf32, #tpu.memory_space<vmem>>, %arg5: memref<1x128xf32, #tpu.memory_space<vmem>>) attributes {dimension_semantics = [#tpu.dimension_semantics<parallel>, #tpu.dimension_semantics<parallel>, #tpu.dimension_semantics<arbitrary>], iteration_bounds = array<i64: 1, 1, 1>, scalar_prefetch = 0 : i64, scratch_operands = 1 : i64, tpu.core_type = #tpu.core_type<tc>, window_params = [{transform_indices = @transform_0, window_bounds = array<i64: 1, 8, 128>}, {transform_indices = @transform_1, window_bounds = array<i64: 1, 8, 128>}]} {
    %c0_i32 = arith.constant 0 : i32
    %0 = arith.cmpi eq, %arg2, %c0_i32 : i32
    %1 = arith.extui %0 : i1 to i32
    %c0_i32_0 = arith.constant 0 : i32
    %2 = arith.cmpi ne, %1, %c0_i32_0 : i32
    scf.if %2 {
      %cst_21 = arith.constant 0xFF800000 : f32
      %78 = vector.broadcast %cst_21 : f32 to vector<1x128xf32>
      %c0_22 = arith.constant 0 : index
      %c0_23 = arith.constant 0 : index
      %79 = vector.load %arg5[%c0_22, %c0_23] : memref<1x128xf32, #tpu.memory_space<vmem>>, vector<1x128xf32>
      tpu.vector_store %arg5[%c0_22, %c0_23], %78 {strides = array<i32>} : memref<1x128xf32, #tpu.memory_space<vmem>>, vector<1x128xf32>,
    } else {
    }
    %3 = tpu.iota {dimensions = array<i32: 0>} : vector<8x128xi32>
    %c0 = arith.constant 0 : index
    %c0_1 = arith.constant 0 : index
    %c0_2 = arith.constant 0 : index
    %4 = vector.load %arg3[%c0, %c0_1, %c0_2] : memref<1x8x128xf32, #tpu.memory_space<vmem>>, vector<1x8x128xf32>
    %5 = vector.shape_cast %4 : vector<1x8x128xf32> to vector<8x128xf32>
    %cst = arith.constant 5.000000e+00 : f32
    %6 = vector.broadcast %cst : f32 to vector<8x128xf32>
    %7 = arith.mulf %5, %6 : vector<8x128xf32>
    %c1_i32 = arith.constant 1 : i32
    %8 = tpu.dynamic_rotate %7 by %c1_i32 dim 0 : vector<8x128xf32>, i32 -> vector<8x128xf32>
    %c1_i32_3 = arith.constant 1 : i32
    %9 = vector.broadcast %c1_i32_3 : i32 to vector<8x128xi32>
    %10 = arith.cmpi sge, %3, %9 : vector<8x128xi32>
    %cst_4 = arith.constant 0xFF800000 : f32
    %11 = vector.broadcast %cst_4 : f32 to vector<8x128xf32>
    %12 = arith.select %10, %8, %11 : vector<8x128xi1>, vector<8x128xf32>
    %13 = arith.maximumf %7, %12 : vector<8x128xf32>
    %14 = arith.subf %7, %12 : vector<8x128xf32>
    %15 = arith.cmpf one, %14, %14 : vector<8x128xf32>
    %16 = arith.addf %7, %12 : vector<8x128xf32>
    %17 = math.absf %14 : vector<8x128xf32>
    %cst_5 = arith.constant 0.000000e+00 : f32
    %18 = vector.broadcast %cst_5 : f32 to vector<8x128xf32>
    %19 = arith.subf %18, %17 : vector<8x128xf32>
    %20 = math.exp %19 : vector<8x128xf32>
    %21 = math.log1p %20 : vector<8x128xf32>
    %22 = arith.addf %13, %21 : vector<8x128xf32>
    %23 = arith.select %15, %16, %22 : vector<8x128xi1>, vector<8x128xf32>
    %c2_i32 = arith.constant 2 : i32
    %24 = tpu.dynamic_rotate %23 by %c2_i32 dim 0 : vector<8x128xf32>, i32 -> vector<8x128xf32>
    %c2_i32_6 = arith.constant 2 : i32
    %25 = vector.broadcast %c2_i32_6 : i32 to vector<8x128xi32>
    %26 = arith.cmpi sge, %3, %25 : vector<8x128xi32>
    %cst_7 = arith.constant 0xFF800000 : f32
    %27 = vector.broadcast %cst_7 : f32 to vector<8x128xf32>
    %28 = arith.select %26, %24, %27 : vector<8x128xi1>, vector<8x128xf32>
    %29 = arith.maximumf %23, %28 : vector<8x128xf32>
    %30 = arith.subf %23, %28 : vector<8x128xf32>
    %31 = arith.cmpf one, %30, %30 : vector<8x128xf32>
    %32 = arith.addf %23, %28 : vector<8x128xf32>
    %33 = math.absf %30 : vector<8x128xf32>
    %cst_8 = arith.constant 0.000000e+00 : f32
    %34 = vector.broadcast %cst_8 : f32 to vector<8x128xf32>
    %35 = arith.subf %34, %33 : vector<8x128xf32>
    %36 = math.exp %35 : vector<8x128xf32>
    %37 = math.log1p %36 : vector<8x128xf32>
    %38 = arith.addf %29, %37 : vector<8x128xf32>
    %39 = arith.select %31, %32, %38 : vector<8x128xi1>, vector<8x128xf32>
    %c4_i32 = arith.constant 4 : i32
    %40 = tpu.dynamic_rotate %39 by %c4_i32 dim 0 : vector<8x128xf32>, i32 -> vector<8x128xf32>
    %c4_i32_9 = arith.constant 4 : i32
    %41 = vector.broadcast %c4_i32_9 : i32 to vector<8x128xi32>
    %42 = arith.cmpi sge, %3, %41 : vector<8x128xi32>
    %cst_10 = arith.constant 0xFF800000 : f32
    %43 = vector.broadcast %cst_10 : f32 to vector<8x128xf32>
    %44 = arith.select %42, %40, %43 : vector<8x128xi1>, vector<8x128xf32>
    %45 = arith.maximumf %39, %44 : vector<8x128xf32>
    %46 = arith.subf %39, %44 : vector<8x128xf32>
    %47 = arith.cmpf one, %46, %46 : vector<8x128xf32>
    %48 = arith.addf %39, %44 : vector<8x128xf32>
    %49 = math.absf %46 : vector<8x128xf32>
    %cst_11 = arith.constant 0.000000e+00 : f32
    %50 = vector.broadcast %cst_11 : f32 to vector<8x128xf32>
    %51 = arith.subf %50, %49 : vector<8x128xf32>
    %52 = math.exp %51 : vector<8x128xf32>
    %53 = math.log1p %52 : vector<8x128xf32>
    %54 = arith.addf %45, %53 : vector<8x128xf32>
    %55 = arith.select %47, %48, %54 : vector<8x128xi1>, vector<8x128xf32>
    %c0_12 = arith.constant 0 : index
    %c0_13 = arith.constant 0 : index
    %56 = vector.load %arg5[%c0_12, %c0_13] : memref<1x128xf32, #tpu.memory_space<vmem>>, vector<1x128xf32>
    %57 = vector.broadcast %56 : vector<1x128xf32> to vector<8x128xf32>
    %58 = arith.maximumf %55, %57 : vector<8x128xf32>
    %59 = vector.broadcast %56 : vector<1x128xf32> to vector<8x128xf32>
    %60 = arith.subf %55, %59 : vector<8x128xf32>
    %61 = arith.cmpf one, %60, %60 : vector<8x128xf32>
    %62 = vector.broadcast %56 : vector<1x128xf32> to vector<8x128xf32>
    %63 = arith.addf %55, %62 : vector<8x128xf32>
    %64 = math.absf %60 : vector<8x128xf32>
    %cst_14 = arith.constant 0.000000e+00 : f32
    %65 = vector.broadcast %cst_14 : f32 to vector<8x128xf32>
    %66 = arith.subf %65, %64 : vector<8x128xf32>
    %67 = math.exp %66 : vector<8x128xf32>
    %68 = math.log1p %67 : vector<8x128xf32>
    %69 = arith.addf %58, %68 : vector<8x128xf32>
    %70 = arith.select %61, %63, %69 : vector<8x128xi1>, vector<8x128xf32>
    %71 = vector.extract_strided_slice %70 {offsets = [7, 0], sizes = [1, 128], strides = [1, 1]} : vector<8x128xf32> to vector<1x128xf32>
    %c0_15 = arith.constant 0 : index
    %c0_16 = arith.constant 0 : index
    %72 = vector.load %arg5[%c0_15, %c0_16] : memref<1x128xf32, #tpu.memory_space<vmem>>, vector<1x128xf32>
    tpu.vector_store %arg5[%c0_15, %c0_16], %71 {strides = array<i32>} : memref<1x128xf32, #tpu.memory_space<vmem>>, vector<1x128xf32>,
    %cst_17 = arith.constant 2.000000e-01 : f32
    %73 = vector.broadcast %cst_17 : f32 to vector<8x128xf32>
    %74 = arith.mulf %70, %73 : vector<8x128xf32>
    %c0_18 = arith.constant 0 : index
    %c0_19 = arith.constant 0 : index
    %c0_20 = arith.constant 0 : index
    %75 = vector.load %arg4[%c0_18, %c0_19, %c0_20] : memref<1x8x128xf32, #tpu.memory_space<vmem>>, vector<1x8x128xf32>
    %76 = vector.shape_cast %75 : vector<1x8x128xf32> to vector<8x128xf32>
    %77 = vector.shape_cast %74 : vector<8x128xf32> to vector<1x8x128xf32>
    tpu.vector_store %arg4[%c0_18, %c0_19, %c0_20], %77 {strides = array<i32>} : memref<1x8x128xf32, #tpu.memory_space<vmem>>, vector<1x8x128xf32>,
    return
  }
  func.func @transform_0(%arg0: i32, %arg1: i32, %arg2: i32) -> (i32, i32, i32) {
    %c0_i32 = arith.constant 0 : i32
    return %arg0, %arg2, %arg1 : i32, i32, i32
  }
  func.func @transform_1(%arg0: i32, %arg1: i32, %arg2: i32) -> (i32, i32, i32) {
    %c0_i32 = arith.constant 0 : i32
    return %arg0, %arg2, %arg1 : i32, i32, i32
  }
}

</mosaic_0001>

<bundles_post_ra>
// kernel: tpu_custom_call.1
= control target key start
LH: loop header
LB: loop body
LE: loop exit
PB: predicated region body
PF: predicated region fallthrough
CT: control target
= control target key end

     0   :  { %6 = vsyncpa [#allocation4], 0  ;;  %s223_s0 = inlined_call_operand.hbm [shape: f32[1,8,128], index: 0, kind: input, shape index: {}]   ;;  %s224_s1 = inlined_call_operand.hbm [shape: f32[1,8,128], index: 1, kind: output, shape index: {}]  }
   0x1   :  { %7 = vsyncpa [#allocation5], 0  ;;  %s204_s6 = smov [#allocation3]  }
   0x2   :  { %s14_s7 = sshll.u32 %s204_s6, 4  ;;  %s15_s7 = int_to_ptr.vmem [resolvable:$true] %s14_s7 }
   0x3   :  { %s168_s8 = scalar_lea.vmem %s15_s7, 128  ;;  %p173_p1 = scmp.lt.s32.totalorder %s15_s7, %s15_s7 }
   0x4   :  { %p169_p0 = scmp.ne.s32.totalorder %s15_s7, %s168_s8  ;;  %p174_p2 = scmp.lt.s32.totalorder %s168_s8, %s168_s8 }
   0x6   :  { %p175_p3 = por %p174_p2, %p173_p1 }
   0x8   :  { %p176_p4 = pnand %p175_p3, %p169_p0 }
   0xa   :  { %179 = shalt.err (!%p176_p4)
}
   0xb   :  { %17 = dma.hbm_to_vmem [thread:$0]  %s223_s0, 128, %s15_s7, [#allocation4]  }
   0xc   :  { %200 = dma.done.wait [#allocation4], 128  }
   0xd   :  { %201 = vsyncadd [#allocation4], 4294967168  ;;  %v205_v0 = vmov -inf   ;;  %v26_v1 = vlaneseq  ;;  %v28_v3 = vld [vmem:[#allocation3] sm:$0xff]  ;;  %s206_s0 = smov [#allocation6]  }
   0xe   :  { %25 = vst [vmem:[#allocation2] sm:$0x1] %v205_v0  ;;  %v29_v4 = vmul.f32 5.0, %v28_v3  ;;  %s131_s11 = sshll.u32 %s206_s0, 4  ;;  %s132_s11 = int_to_ptr.vmem [resolvable:$true] %s131_s11 }
   0xf   :  { %v27_v2 = vshrl.u32 %v26_v1, 7  ;;  %s180_s12 = scalar_lea.vmem %s132_s11, 128  ;;  %p185_p6 = scmp.lt.s32.totalorder %s132_s11, %s132_s11 }
  0x10   :  { %v30_v5 = vrot.slane %v29_v4, 7  ;;  %p181_p5 = scmp.ne.s32.totalorder %s132_s11, %s180_s12  ;;  %p186_p7 = scmp.lt.s32.totalorder %s180_s12, %s180_s12 }
  0x11   :  { %vm31_vm0 = vcmp.ge.s32.totalorder %v27_v2, 1  ;;  %vm53_vm3 = vcmp.ge.s32.totalorder %v27_v2, 2  ;;  %vm75_vm6 = vcmp.ge.s32.totalorder %v27_v2, 4 }
  0x12   :  { %v32_v6 = vsel %vm31_vm0, %v30_v5, -inf  ;;  %p187_p8 = por %p186_p7, %p185_p6 }
  0x13   :  { %v34_v7 = vsub.f32 %v29_v4, %v32_v6  ;;  %v33_v18 = vmax.f32 %v29_v4, %v32_v6  ;;  %v36_v20 = vadd.f32 %v32_v6, %v29_v4 }
  0x14   :  { %p188_p9 = pnand %p187_p8, %p181_p5 }
  0x15   :  { %v37_v8 = vand.u32 2147483647, %v34_v7  ;;  %vm35_vm2 = vcmp.ne.f32.partialorder %v34_v7, %v34_v7  ;;  %v140_v61 = vld [vmem:[#allocation2] ss:$0 sm:$0xff] }
  0x17   :  { %v38_v9 = vsub.f32 0.0, %v37_v8 }
  0x19   :  { %v39_v10 = vmul.f32 1.442695, %v38_v9 }
  0x1b   :  { %144 = vpow2.f32 %v39_v10 }
  0x28   :  { %v145_v11 = vpop.eup %144 }
  0x29   :  { %v41_v12 = vadd.f32 1.0, %v145_v11  ;;  %v44_v13 = vmul.f32 -0.5, %v145_v11  ;;  %v47_v15 = vand.u32 2147483647, %v145_v11 }
  0x2b   :  { %146 = vlog2.f32 %v41_v12  ;;  %v45_v14 = vadd.f32 1.0, %v44_v13  ;;  %vm48_vm1 = vcmp.lt.f32.partialorder %v47_v15, 0.0004427343 }
  0x2d   :  { %v46_v16 = vmul.f32 %v145_v11, %v45_v14 }
  0x38   :  { %v147_v17 = vpop.eup %146 }
  0x39   :  { %v43_v19 = vmul.f32 0.6931472, %v147_v17 }
  0x3b   :  { %v49_v21 = vsel %vm48_vm1, %v46_v16, %v43_v19 }
  0x3c   :  { %v50_v22 = vadd.f32 %v49_v21, %v33_v18 }
  0x3e   :  { %v51_v23 = vsel %vm35_vm2, %v36_v20, %v50_v22 }
  0x3f   :  { %v52_v24 = vrot.slane %v51_v23, 6 }
  0x41   :  { %v54_v25 = vsel %vm53_vm3, %v52_v24, -inf }
  0x42   :  { %v56_v26 = vsub.f32 %v51_v23, %v54_v25  ;;  %v55_v37 = vmax.f32 %v51_v23, %v54_v25  ;;  %v58_v39 = vadd.f32 %v54_v25, %v51_v23 }
  0x44   :  { %v59_v27 = vand.u32 2147483647, %v56_v26  ;;  %vm57_vm5 = vcmp.ne.f32.partialorder %v56_v26, %v56_v26 }
  0x46   :  { %v60_v28 = vsub.f32 0.0, %v59_v27 }
  0x48   :  { %v61_v29 = vmul.f32 1.442695, %v60_v28 }
  0x4a   :  { %148 = vpow2.f32 %v61_v29 }
  0x57   :  { %v149_v30 = vpop.eup %148 }
  0x58   :  { %v63_v31 = vadd.f32 1.0, %v149_v30  ;;  %v66_v32 = vmul.f32 -0.5, %v149_v30  ;;  %v69_v34 = vand.u32 2147483647, %v149_v30 }
  0x5a   :  { %150 = vlog2.f32 %v63_v31  ;;  %v67_v33 = vadd.f32 1.0, %v66_v32  ;;  %vm70_vm4 = vcmp.lt.f32.partialorder %v69_v34, 0.0004427343 }
  0x5c   :  { %v68_v35 = vmul.f32 %v149_v30, %v67_v33 }
  0x67   :  { %v151_v36 = vpop.eup %150 }
  0x68   :  { %v65_v38 = vmul.f32 0.6931472, %v151_v36 }
  0x6a   :  { %v71_v40 = vsel %vm70_vm4, %v68_v35, %v65_v38 }
  0x6b   :  { %v72_v41 = vadd.f32 %v71_v40, %v55_v37 }
  0x6d   :  { %v73_v42 = vsel %vm57_vm5, %v58_v39, %v72_v41 }
  0x6e   :  { %v74_v43 = vrot.slane %v73_v42, 4 }
  0x70   :  { %v76_v44 = vsel %vm75_vm6, %v74_v43, -inf }
  0x71   :  { %v78_v45 = vsub.f32 %v73_v42, %v76_v44  ;;  %v77_v56 = vmax.f32 %v73_v42, %v76_v44  ;;  %v80_v58 = vadd.f32 %v76_v44, %v73_v42 }
  0x73   :  { %v81_v46 = vand.u32 2147483647, %v78_v45  ;;  %vm79_vm8 = vcmp.ne.f32.partialorder %v78_v45, %v78_v45 }
  0x75   :  { %v82_v47 = vsub.f32 0.0, %v81_v46 }
  0x77   :  { %v83_v48 = vmul.f32 1.442695, %v82_v47 }
  0x79   :  { %152 = vpow2.f32 %v83_v48 }
  0x86   :  { %v153_v49 = vpop.eup %152 }
  0x87   :  { %v85_v50 = vadd.f32 1.0, %v153_v49  ;;  %v88_v51 = vmul.f32 -0.5, %v153_v49  ;;  %v91_v53 = vand.u32 2147483647, %v153_v49 }
  0x89   :  { %154 = vlog2.f32 %v85_v50  ;;  %v89_v52 = vadd.f32 1.0, %v88_v51  ;;  %vm92_vm7 = vcmp.lt.f32.partialorder %v91_v53, 0.0004427343 }
  0x8b   :  { %v90_v54 = vmul.f32 %v153_v49, %v89_v52 }
  0x96   :  { %v155_v55 = vpop.eup %154 }
  0x97   :  { %v87_v57 = vmul.f32 0.6931472, %v155_v55 }
  0x99   :  { %v93_v59 = vsel %vm92_vm7, %v90_v54, %v87_v57 }
  0x9a   :  { %v94_v60 = vadd.f32 %v93_v59, %v77_v56 }
  0x9c   :  { %v95_v62 = vsel %vm79_vm8, %v80_v58, %v94_v60 }
  0x9d   :  { %v104_v63 = vsub.f32 %v95_v62, %v140_v61  ;;  %v103_v11 = vmax.f32 %v95_v62, %v140_v61  ;;  %v106_v13 = vadd.f32 %v140_v61, %v95_v62 }
  0x9f   :  { %v107_v0 = vand.u32 2147483647, %v104_v63  ;;  %vm105_vm10 = vcmp.ne.f32.partialorder %v104_v63, %v104_v63 }
  0xa1   :  { %v108_v1 = vsub.f32 0.0, %v107_v0 }
  0xa3   :  { %v109_v2 = vmul.f32 1.442695, %v108_v1 }
  0xa5   :  { %156 = vpow2.f32 %v109_v2 }
  0xb2   :  { %v157_v3 = vpop.eup %156 }
  0xb3   :  { %v111_v4 = vadd.f32 1.0, %v157_v3  ;;  %v114_v5 = vmul.f32 -0.5, %v157_v3  ;;  %v117_v7 = vand.u32 2147483647, %v157_v3 }
  0xb5   :  { %158 = vlog2.f32 %v111_v4  ;;  %v115_v6 = vadd.f32 1.0, %v114_v5  ;;  %vm118_vm9 = vcmp.lt.f32.partialorder %v117_v7, 0.0004427343 }
  0xb7   :  { %v116_v10 = vmul.f32 %v157_v3, %v115_v6 }
  0xc2   :  { %v159_v8 = vpop.eup %158 }
  0xc3   :  { %v113_v9 = vmul.f32 0.6931472, %v159_v8 }
  0xc5   :  { %v119_v12 = vsel %vm118_vm9, %v116_v10, %v113_v9 }
  0xc6   :  { %v120_v14 = vadd.f32 %v119_v12, %v103_v11 }
  0xc8   :  { %v121_v15 = vsel %vm105_vm10, %v106_v13, %v120_v14 }
  0xc9   :  { %122 = vst [vmem:[#allocation2 - $0x7] sm:$0x80] %v121_v15  ;;  %v123_v16 = vmul.f32 0.2, %v121_v15 }
  0xcb   :  { %124 = vst [vmem:[#allocation6] sm:$0xff] %v123_v16 }
  0xcc   :  { %191 = shalt.err (!%p188_p9)
}
  0xcd   :  { %134 = dma.vmem_to_hbm [thread:$0]  %s132_s11, 128, %s224_s1, [#allocation5]  }
  0xce   :  { %202 = dma.done.wait [#allocation5], 128  }
  0xcf   :  { %203 = vsyncadd [#allocation5], 4294967168 }
  0xd0   :  { %138 = vsyncpa [#allocation4], 1 }
  0xd1   :  { %139 = vsyncpa [#allocation5], 1 }

</bundles_post_ra>
